<compile_context>
chip_gen: v5e
topology: v5e:2x2
jax: 0.10.0
libtpu: 0.0.40
codegen_flags: <defaults>
</compile_context>

<pallas_src>
import jax
import jax.numpy as jnp
from jax.experimental import pallas as pl
from jax.experimental.pallas import tpu as pltpu


K = 128
EDGE_TYPES = 1024


def _round_up(x, m):
    return ((x + m - 1) // m) * m


def _gaussian_kernel(xk_ref, c_ref, o_ref):
    # xk_ref: (tm, 1)  f32 -- fused mul*x + bias per edge (sublane-major column)
    # c_ref:  (8, K)   f32 -- row 0 = mean, row 1 = 1/std, row 2 = 1/(a*std)
    # o_ref:  (tm, K)  final output dtype -- stored exactly once, lane-dense
    xk = xk_ref[...]
    mean = c_ref[0:1, :]
    inv_std = c_ref[1:2, :]
    coeff = c_ref[2:3, :]

    z = (xk - mean) * inv_std                      # (tm, K) f32, no divides
    o_ref[...] = (jnp.exp(-0.5 * (z * z)) * coeff).astype(o_ref.dtype)


def gaussian_layer(x, edge_type, means_w, stds_w, mul_w, bias_w, *, tm=8192):
    """Forward pass of GaussianLayer.

    x:         [B, N, N] float
    edge_type: [B, N, N] int32 in [0, EDGE_TYPES)
    means_w:   [1, K]    float (nn.Embedding(1, K).weight)
    stds_w:    [1, K]    float
    mul_w:     [EDGE_TYPES, 1] float
    bias_w:    [EDGE_TYPES, 1] float
    returns:   [B, N, N, K] in means_w.dtype
    """
    B, N, N2 = x.shape
    assert N == N2
    M = B * N * N
    out_dtype = means_w.dtype

    # Embedding gathers (dim-1) + fused FMA in x's dtype (matches
    # `mul * x.unsqueeze(-1) + bias` before the .float() in the reference),
    # then a single f32 promotion.  One (M, 1) input stream instead of three.
    mul_g = mul_w[edge_type, 0].astype(x.dtype)     # [B, N, N]
    bias_g = bias_w[edge_type, 0].astype(x.dtype)   # [B, N, N]
    xk = (mul_g * x + bias_g).astype(jnp.float32).reshape(M, 1)

    # Hoisted (1, K) constant math (abs, +1e-5, reciprocals) packed into one
    # (8, K) operand: no per-element divides in the hot loop, one DMA stream.
    a = (2.0 * 3.14159) ** 0.5                      # same pi as the torch fn
    mean = means_w.astype(jnp.float32).reshape(1, K)
    std = jnp.abs(stds_w.astype(jnp.float32).reshape(1, K)) + 1e-5
    consts = jnp.concatenate(
        [mean, 1.0 / std, 1.0 / (a * std), jnp.zeros((5, K), jnp.float32)], axis=0
    )                                               # (8, K)

    # Tile selection: big blocks to amortize per-step overhead; the last block
    # may be ragged (Pallas masks the writeback) so there is no pad / slice
    # round trip.  Cap tm so the grid has >= 2 steps when there is enough
    # work, so v7x's two TensorCores both get a share of the write stream.
    m_round8 = _round_up(M, 8)
    tm_eff = min(tm, m_round8)
    if m_round8 >= 2048:
        tm_eff = min(tm_eff, _round_up(pl.cdiv(m_round8, 2), 8))
    grid = pl.cdiv(M, tm_eff)

    # VMEM budget (double-buffered): the (tm, 1) f32 input is lane-padded to
    # tm*512 B / buffer; output is tm*128*itemsize B / buffer.  32 MiB covers
    # tm=8192 even with an f32 output and is legal on v5e / v6e / v7x.
    out_isz = jnp.dtype(out_dtype).itemsize
    per_step = 2 * tm_eff * 128 * (4 + out_isz)
    vmem_limit = int(min(56 << 20, max(32 << 20, per_step + (4 << 20))))

    out = pl.pallas_call(
        _gaussian_kernel,
        out_shape=jax.ShapeDtypeStruct((M, K), out_dtype),
        grid_spec=pltpu.PrefetchScalarGridSpec(
            num_scalar_prefetch=0,
            grid=(grid,),
            in_specs=[
                pl.BlockSpec((tm_eff, 1), lambda i: (i, 0)),
                pl.BlockSpec((8, K), lambda i: (0, 0)),
            ],
            out_specs=pl.BlockSpec((tm_eff, K), lambda i: (i, 0)),
        ),
        compiler_params=pltpu.CompilerParams(
            dimension_semantics=("parallel",),
            vmem_limit_bytes=vmem_limit,
        ),
    )(xk, consts)

    # Output already in means_w.dtype (.type_as(self.means.weight)); no cast.
    return out.reshape(B, N, N, K)


def _reference(x, edge_type, means_w, stds_w, mul_w, bias_w):
    mul = mul_w[edge_type].astype(x.dtype)          # [B, N, N, 1]
    bias = bias_w[edge_type].astype(x.dtype)        # [B, N, N, 1]
    xk = mul * x[..., None] + bias                  # [B, N, N, 1]
    xk = jnp.broadcast_to(xk, xk.shape[:-1] + (K,)).astype(jnp.float32)
    mean = means_w.astype(jnp.float32).reshape(-1)
    std = jnp.abs(stds_w.astype(jnp.float32).reshape(-1)) + 1e-5
    a = (2.0 * 3.14159) ** 0.5
    return (jnp.exp(-0.5 * ((xk - mean) / std) ** 2) / (a * std)).astype(means_w.dtype)


if __name__ == "__main__":
    key = jax.random.PRNGKey(0)
    k_means, k_stds, k_x, k_et = jax.random.split(key, 4)

    # Deterministic parameter init matching the module's __init__.
    means_w = jax.random.uniform(k_means, (1, K), jnp.float32, 0.0, 3.0)
    stds_w = jax.random.uniform(k_stds, (1, K), jnp.float32, 0.0, 3.0)
    mul_w = jnp.ones((EDGE_TYPES, 1), jnp.float32)      # init.constant_(1)
    bias_w = jnp.zeros((EDGE_TYPES, 1), jnp.float32)    # init.constant_(0)

    # Small example inputs: batch=2, nodes=16 -> x [2, 16, 16], edge_type [2, 16, 16]
    B, N = 2, 16
    x = jax.random.uniform(k_x, (B, N, N), jnp.float32, 0.0, 5.0)
    edge_type = jax.random.randint(k_et, (B, N, N), 0, EDGE_TYPES, jnp.int32)

    out = gaussian_layer(x, edge_type, means_w, stds_w, mul_w, bias_w)
    out = jax.block_until_ready(out)

    ref = _reference(x, edge_type, means_w, stds_w, mul_w, bias_w)
    assert out.shape == (B, N, N, K)
    assert out.dtype == means_w.dtype
    assert jnp.allclose(out, ref, atol=1e-5, rtol=1e-4)

    print("KERNEL_OK")
</pallas_src>

<mosaic_0001>
module attributes {stable_mosaic.version = 11 : i64} {
  func.func @_gaussian_kernel(%arg0: i32, %arg1: memref<512x1xf32, #tpu.memory_space<vmem>>, %arg2: memref<8x128xf32, #tpu.memory_space<vmem>>, %arg3: memref<512x128xf32, #tpu.memory_space<vmem>>) attributes {dimension_semantics = [#tpu.dimension_semantics<parallel>], iteration_bounds = array<i64: 1>, scalar_prefetch = 0 : i64, scratch_operands = 0 : i64, tpu.core_type = #tpu.core_type<tc>, window_params = [{transform_indices = @transform_0, window_bounds = array<i64: 512, 1>}, {pipeline_mode = #tpu.pipeline_mode<synchronous>, transform_indices = @transform_1, window_bounds = array<i64: 8, 128>}, {transform_indices = @transform_2, window_bounds = array<i64: 512, 128>}]} {
    %c0 = arith.constant 0 : index
    %c0_0 = arith.constant 0 : index
    %0 = vector.load %arg1[%c0, %c0_0] : memref<512x1xf32, #tpu.memory_space<vmem>>, vector<512x1xf32>
    %c0_1 = arith.constant 0 : index
    %c0_2 = arith.constant 0 : index
    %1 = vector.load %arg2[%c0_1, %c0_2] : memref<8x128xf32, #tpu.memory_space<vmem>>, vector<1x128xf32>
    %c1 = arith.constant 1 : index
    %c0_3 = arith.constant 0 : index
    %2 = vector.load %arg2[%c1, %c0_3] : memref<8x128xf32, #tpu.memory_space<vmem>>, vector<1x128xf32>
    %c2 = arith.constant 2 : index
    %c0_4 = arith.constant 0 : index
    %3 = vector.load %arg2[%c2, %c0_4] : memref<8x128xf32, #tpu.memory_space<vmem>>, vector<1x128xf32>
    %4 = vector.broadcast %0 : vector<512x1xf32> to vector<512x128xf32>
    %5 = vector.broadcast %1 : vector<1x128xf32> to vector<512x128xf32>
    %6 = arith.subf %4, %5 : vector<512x128xf32>
    %7 = vector.broadcast %2 : vector<1x128xf32> to vector<512x128xf32>
    %8 = arith.mulf %6, %7 : vector<512x128xf32>
    %9 = arith.mulf %8, %8 : vector<512x128xf32>
    %cst = arith.constant -5.000000e-01 : f32
    %10 = vector.broadcast %cst : f32 to vector<512x128xf32>
    %11 = arith.mulf %10, %9 : vector<512x128xf32>
    %12 = math.exp %11 : vector<512x128xf32>
    %13 = vector.broadcast %3 : vector<1x128xf32> to vector<512x128xf32>
    %14 = arith.mulf %12, %13 : vector<512x128xf32>
    %c0_5 = arith.constant 0 : index
    %c0_6 = arith.constant 0 : index
    %15 = vector.load %arg3[%c0_5, %c0_6] : memref<512x128xf32, #tpu.memory_space<vmem>>, vector<512x128xf32>
    tpu.vector_store %arg3[%c0_5, %c0_6], %14 {strides = array<i32>} : memref<512x128xf32, #tpu.memory_space<vmem>>, vector<512x128xf32>,
    return
  }
  func.func @transform_0(%arg0: i32) -> (i32, i32) {
    %c0_i32 = arith.constant 0 : i32
    %c0_i32_0 = arith.constant 0 : i32
    return %arg0, %c0_i32 : i32, i32
  }
  func.func @transform_1(%arg0: i32) -> (i32, i32) {
    %c0_i32 = arith.constant 0 : i32
    %c0_i32_0 = arith.constant 0 : i32
    %c0_i32_1 = arith.constant 0 : i32
    return %c0_i32, %c0_i32_0 : i32, i32
  }
  func.func @transform_2(%arg0: i32) -> (i32, i32) {
    %c0_i32 = arith.constant 0 : i32
    %c0_i32_0 = arith.constant 0 : i32
    return %arg0, %c0_i32 : i32, i32
  }
}

</mosaic_0001>

<bundles_post_ra>
// kernel: tpu_custom_call.1
= control target key start
LH: loop header
LB: loop body
LE: loop exit
PB: predicated region body
PF: predicated region fallthrough
CT: control target
= control target key end

     0   :  { %v1099_v3 = vmov 0   ;;  %s1535_s0 = inlined_call_operand.vmem [shape: f32[512,1], index: 0, kind: input, shape index: {}]   ;;  %s1536_s1 = inlined_call_operand.vmem [shape: f32[8,128], index: 1, kind: input, shape index: {}]   ;;  %s1537_s2 = inlined_call_operand.hbm [shape: f32[512,128], index: 2, kind: output, shape index: {}]  }
   0x1   :  { %v16_v0 = vld [vmem:[%s1535_s0 + $0x20] sm:$0xff]  ;;  %v14_v1 = vld [vmem:[%s1535_s0 + $0x10] sm:$0xff]  ;;  %938 = vset.pattern.permute.xlu2 %v1099_v3  ;;  %937 = vset.pattern.permute.xlu1 %v1099_v3 }
   0x2   :  { %v12_v2 = vld [vmem:[%s1535_s0] sm:$0xff]  ;;  %936 = vset.pattern.permute.xlu0 %v1099_v3  ;;  %101 = vperm.xlu2 %938, %v16_v0  }
   0x3   :  { %91 = vperm.xlu1 %937, %v14_v1   ;;  %81 = vperm.xlu0 %936, %v12_v2  }
   0x4   :  { %7 = vsyncpa [#allocation3], 0  ;;  %v17_v4 = vld [vmem:[%s1535_s0 + $0x28] sm:$0xff]  ;;  %v15_v5 = vld [vmem:[%s1535_s0 + $0x18] sm:$0xff]  ;;  %s920_s11 = sshll.u32 %s1537_s2, 4  ;;  %s1101_s12 = smov 128   ;;  %s921_s11 = int_to_ptr.hbm [resolvable:$true] %s920_s11 }
   0x5   :  { %v13_v6 = vld [vmem:[%s1535_s0 + $0x8] sm:$0xff]  ;;  %v20_v7 = vld [vmem:[%s1535_s0 + $0x40] sm:$0xff]  ;;  %v19_v8 = vld [vmem:[%s1535_s0 + $0x38] sm:$0xff]  ;;  %s1102_s13 = smov 8  }
   0x6   :  { %v18_v9 = vld [vmem:[%s1535_s0 + $0x30] sm:$0xff]  ;;  %v23_v10 = vld [vmem:[%s1535_s0 + $0x58] sm:$0xff]  ;;  %v21_v12 = vld [vmem:[%s1535_s0 + $0x48] sm:$0xff] }
   0x7   :  { %v22_v11 = vld [vmem:[%s1535_s0 + $0x50] sm:$0xff]  ;;  %v25_v14 = vld [vmem:[%s1535_s0 + $0x68] sm:$0xff]  ;;  %v24_v15 = vld [vmem:[%s1535_s0 + $0x60] sm:$0xff] }
   0x8   :  { %v26_v13 = vld [vmem:[%s1535_s0 + $0x70] sm:$0xff]  ;;  %v29_v16 = vld [vmem:[%s1535_s0 + $0x88] sm:$0xff]  ;;  %v28_v17 = vld [vmem:[%s1535_s0 + $0x80] sm:$0xff] }
   0x9   :  { %v27_v18 = vld [vmem:[%s1535_s0 + $0x78] sm:$0xff]  ;;  %v32_v19 = vld [vmem:[%s1535_s0 + $0xa0] sm:$0xff]  ;;  %v30_v21 = vld [vmem:[%s1535_s0 + $0x90] sm:$0xff] }
   0xa   :  { %106 = vperm.xlu2 %938, %v17_v4   ;;  %v31_v20 = vld [vmem:[%s1535_s0 + $0x98] sm:$0xff]  ;;  %v34_v23 = vld [vmem:[%s1535_s0 + $0xb0] sm:$0xff]  ;;  %v33_v24 = vld [vmem:[%s1535_s0 + $0xa8] sm:$0xff] }
   0xb   :  { %96 = vperm.xlu1 %937, %v15_v5   ;;  %86 = vperm.xlu0 %936, %v13_v6   ;;  %v35_v22 = vld [vmem:[%s1535_s0 + $0xb8] sm:$0xff]  ;;  %v38_v25 = vld [vmem:[%s1535_s0 + $0xd0] sm:$0xff]  ;;  %v37_v26 = vld [vmem:[%s1535_s0 + $0xc8] sm:$0xff] }
   0xc   :  { %v36_v27 = vld [vmem:[%s1535_s0 + $0xc0] sm:$0xff]  ;;  %v41_v28 = vld [vmem:[%s1535_s0 + $0xe8] sm:$0xff]  ;;  %v39_v30 = vld [vmem:[%s1535_s0 + $0xd8] sm:$0xff] }
   0xd   :  { %v40_v29 = vld [vmem:[%s1535_s0 + $0xe0] sm:$0xff]  ;;  %v43_v32 = vld [vmem:[%s1535_s0 + $0xf8] sm:$0xff]  ;;  %v42_v33 = vld [vmem:[%s1535_s0 + $0xf0] sm:$0xff] }
   0xe   :  { %v44_v31 = vld [vmem:[%s1535_s0 + $0x100] sm:$0xff]  ;;  %v47_v34 = vld [vmem:[%s1535_s0 + $0x118] sm:$0xff]  ;;  %v46_v35 = vld [vmem:[%s1535_s0 + $0x110] sm:$0xff] }
   0xf   :  { %v45_v36 = vld [vmem:[%s1535_s0 + $0x108] sm:$0xff]  ;;  %v1229_v37 = vld [vmem:[%s1536_s1] ss:$0 sm:$0xff]  ;;  %v1234_v39 = vld [vmem:[%s1536_s1 + $0x1] ss:$0 sm:$0xff] }
  0x10   :  { %v50_v42 = vld [vmem:[%s1535_s0 + $0x130] sm:$0xff]  ;;  %v49_v43 = vld [vmem:[%s1535_s0 + $0x128] sm:$0xff]  ;;  %v48_v44 = vld [vmem:[%s1535_s0 + $0x120] sm:$0xff] }
  0x11   :  { %v53_v51 = vld [vmem:[%s1535_s0 + $0x148] sm:$0xff]  ;;  %v52_v52 = vld [vmem:[%s1535_s0 + $0x140] sm:$0xff]  ;;  %v51_v53 = vld [vmem:[%s1535_s0 + $0x138] sm:$0xff] }
  0x12   :  { %121 = vperm.xlu2 %938, %v20_v7   ;;  %v1261_v56 = vld [vmem:[%s1536_s1 + $0x2] ss:$0 sm:$0xff]  ;;  %v55_v0 = vld [vmem:[%s1535_s0 + $0x158] sm:$0xff]  ;;  %v54_v1 = vld [vmem:[%s1535_s0 + $0x150] sm:$0xff] }
  0x13   :  { %116 = vperm.xlu1 %937, %v19_v8   ;;  %111 = vperm.xlu0 %936, %v18_v9   ;;  %v56_v63 = vld [vmem:[%s1535_s0 + $0x160] sm:$0xff] }
  0x1a   :  { %136 = vperm.xlu2 %938, %v23_v10  }
  0x1b   :  { %131 = vperm.xlu1 %937, %v22_v11   ;;  %126 = vperm.xlu0 %936, %v21_v12  }
  0x22   :  { %151 = vperm.xlu2 %938, %v26_v13  }
  0x23   :  { %146 = vperm.xlu1 %937, %v25_v14   ;;  %141 = vperm.xlu0 %936, %v24_v15   ;;  %v59_v14 = vld [vmem:[%s1535_s0 + $0x178] sm:$0xff] }
  0x2a   :  { %166 = vperm.xlu2 %938, %v29_v16  }
  0x2b   :  { %161 = vperm.xlu1 %937, %v28_v17   ;;  %156 = vperm.xlu0 %936, %v27_v18   ;;  %v58_v17 = vld [vmem:[%s1535_s0 + $0x170] sm:$0xff]  ;;  %v57_v18 = vld [vmem:[%s1535_s0 + $0x168] sm:$0xff] }
  0x32   :  { %181 = vperm.xlu2 %938, %v32_v19  }
  0x33   :  { %176 = vperm.xlu1 %937, %v31_v20   ;;  %171 = vperm.xlu0 %936, %v30_v21  }
  0x3a   :  { %196 = vperm.xlu2 %938, %v35_v22  }
  0x3b   :  { %191 = vperm.xlu1 %937, %v34_v23   ;;  %186 = vperm.xlu0 %936, %v33_v24  }
  0x42   :  { %211 = vperm.xlu2 %938, %v38_v25  }
  0x43   :  { %206 = vperm.xlu1 %937, %v37_v26   ;;  %201 = vperm.xlu0 %936, %v36_v27  }
  0x4a   :  { %226 = vperm.xlu2 %938, %v41_v28  }
  0x4b   :  { %221 = vperm.xlu1 %937, %v40_v29   ;;  %216 = vperm.xlu0 %936, %v39_v30  }
  0x52   :  { %241 = vperm.xlu2 %938, %v44_v31  }
  0x53   :  { %236 = vperm.xlu1 %937, %v43_v32   ;;  %231 = vperm.xlu0 %936, %v42_v33  }
  0x5a   :  { %256 = vperm.xlu2 %938, %v47_v34  }
  0x5b   :  { %251 = vperm.xlu1 %937, %v46_v35   ;;  %246 = vperm.xlu0 %936, %v45_v36  }
  0x5c   :  { %v102_v38 = vpop.permute.xlu2 %101 }
  0x5d   :  { %v404_v40 = vsub.f32 %v102_v38, %v1229_v37  ;;  %v62_v38 = vld [vmem:[%s1535_s0 + $0x190] sm:$0xff] }
  0x5f   :  { %v469_v41 = vmul.f32 %v1234_v39, %v404_v40 }
  0x61   :  { %v533_v45 = vmul.f32 %v469_v41, %v469_v41  ;;  %v61_v41 = vld [vmem:[%s1535_s0 + $0x188] sm:$0xff] }
  0x62   :  { %271 = vperm.xlu2 %938, %v50_v42   ;;  %v60_v42 = vld [vmem:[%s1535_s0 + $0x180] sm:$0xff] }
  0x63   :  { %v597_v46 = vmul.f32 -0.5, %v533_v45  ;;  %266 = vperm.xlu1 %937, %v49_v43   ;;  %261 = vperm.xlu0 %936, %v48_v44  }
  0x64   :  { %v107_v47 = vpop.permute.xlu2 %106 }
  0x65   :  { %v665_v48 = vmul.f32 1.442695, %v597_v46  ;;  %v405_v49 = vsub.f32 %v107_v47, %v1229_v37 }
  0x67   :  { %942 = vpow2.f32 %v665_v48  ;;  %v470_v50 = vmul.f32 %v1234_v39, %v405_v49 }
  0x69   :  { %v534_v54 = vmul.f32 %v470_v50, %v470_v50 }
  0x6a   :  { %286 = vperm.xlu2 %938, %v53_v51  }
  0x6b   :  { %v598_v55 = vmul.f32 -0.5, %v534_v54  ;;  %281 = vperm.xlu1 %937, %v52_v52   ;;  %276 = vperm.xlu0 %936, %v51_v53  }
  0x6c   :  { %v122_v57 = vpop.permute.xlu2 %121 }
  0x6d   :  { %v943_v58 = vpop.eup %942  ;;  %v667_v59 = vmul.f32 1.442695, %v598_v55  ;;  %v408_v60 = vsub.f32 %v122_v57, %v1229_v37 }
  0x6e   :  { %v790_v61 = vmul.f32 %v943_v58, %v1261_v56 }
  0x6f   :  { %944 = vpow2.f32 %v667_v59  ;;  %v473_v62 = vmul.f32 %v1234_v39, %v408_v60 }
  0x70   :  { %854 = vst [vmem:[#allocation2 + $0x20] sm:$0xff] %v790_v61 }
  0x71   :  { %v537_v2 = vmul.f32 %v473_v62, %v473_v62 }
  0x72   :  { %301 = vperm.xlu2 %938, %v56_v63  }
  0x73   :  { %v601_v3 = vmul.f32 -0.5, %v537_v2  ;;  %296 = vperm.xlu1 %937, %v55_v0   ;;  %291 = vperm.xlu0 %936, %v54_v1   ;;  %v65_v2 = vld [vmem:[%s1535_s0 + $0x1a8] sm:$0xff] }
  0x74   :  { %v137_v4 = vpop.permute.xlu2 %136 }
  0x75   :  { %v945_v5 = vpop.eup %944  ;;  %v673_v6 = vmul.f32 1.442695, %v601_v3  ;;  %v411_v7 = vsub.f32 %v137_v4, %v1229_v37  ;;  %v92_v8 = vpop.permute.xlu1 %91 }
  0x76   :  { %v82_v9 = vpop.permute.xlu0 %81  ;;  %v791_v10 = vmul.f32 %v945_v5, %v1261_v56  ;;  %v402_v11 = vsub.f32 %v92_v8, %v1229_v37 }
  0x77   :  { %v400_v12 = vsub.f32 %v82_v9, %v1229_v37  ;;  %946 = vpow2.f32 %v673_v6  ;;  %v476_v13 = vmul.f32 %v1234_v39, %v411_v7  ;;  %v64_v6 = vld [vmem:[%s1535_s0 + $0x1a0] sm:$0xff]  ;;  %v63_v7 = vld [vmem:[%s1535_s0 + $0x198] sm:$0xff] }
  0x78   :  { %855 = vst [vmem:[#allocation2 + $0x28] sm:$0xff] %v791_v10  ;;  %v467_v15 = vmul.f32 %v1234_v39, %v402_v11 }
  0x79   :  { %v465_v16 = vmul.f32 %v1234_v39, %v400_v12  ;;  %v540_v19 = vmul.f32 %v476_v13, %v476_v13 }
  0x7a   :  { %v531_v20 = vmul.f32 %v467_v15, %v467_v15  ;;  %316 = vperm.xlu2 %938, %v59_v14  }
  0x7b   :  { %v529_v21 = vmul.f32 %v465_v16, %v465_v16  ;;  %v604_v22 = vmul.f32 -0.5, %v540_v19  ;;  %311 = vperm.xlu1 %937, %v58_v17   ;;  %306 = vperm.xlu0 %936, %v57_v18  }
  0x7c   :  { %v595_v23 = vmul.f32 -0.5, %v531_v20  ;;  %v152_v25 = vpop.permute.xlu2 %151 }
  0x7d   :  { %v593_v24 = vmul.f32 -0.5, %v529_v21  ;;  %v947_v26 = vpop.eup %946  ;;  %v679_v27 = vmul.f32 1.442695, %v604_v22  ;;  %v414_v28 = vsub.f32 %v152_v25, %v1229_v37  ;;  %v97_v29 = vpop.permute.xlu1 %96 }
  0x7e   :  { %v87_v30 = vpop.permute.xlu0 %86  ;;  %v794_v31 = vmul.f32 %v947_v26, %v1261_v56  ;;  %v661_v32 = vmul.f32 1.442695, %v595_v23  ;;  %v403_v34 = vsub.f32 %v97_v29, %v1229_v37  ;;  %v68_v29 = vld [vmem:[%s1535_s0 + $0x1c0] sm:$0xff] }
  0x7f   :  { %v657_v33 = vmul.f32 1.442695, %v593_v24  ;;  %948 = vpow2.f32 %v679_v27  ;;  %v479_v35 = vmul.f32 %v1234_v39, %v414_v28  ;;  %v401_v36 = vsub.f32 %v87_v30, %v1229_v37 }
  0x80   :  { %858 = vst [vmem:[#allocation2 + $0x40] sm:$0xff] %v794_v31  ;;  %950 = vpow2.f32 %v661_v32  ;;  %v468_v40 = vmul.f32 %v1234_v39, %v403_v34  ;;  %v67_v32 = vld [vmem:[%s1535_s0 + $0x1b8] sm:$0xff] }
  0x81   :  { %952 = vpow2.f32 %v657_v33  ;;  %v543_v43 = vmul.f32 %v479_v35, %v479_v35  ;;  %v466_v44 = vmul.f32 %v1234_v39, %v401_v36  ;;  %v66_v33 = vld [vmem:[%s1535_s0 + $0x1b0] sm:$0xff] }
  0x82   :  { %v532_v45 = vmul.f32 %v468_v40, %v468_v40  ;;  %331 = vperm.xlu2 %938, %v62_v38  }
  0x83   :  { %v607_v46 = vmul.f32 -0.5, %v543_v43  ;;  %v530_v47 = vmul.f32 %v466_v44, %v466_v44  ;;  %326 = vperm.xlu1 %937, %v61_v41   ;;  %321 = vperm.xlu0 %936, %v60_v42  }
  0x84   :  { %v596_v48 = vmul.f32 -0.5, %v532_v45  ;;  %v167_v49 = vpop.permute.xlu2 %166 }
  0x85   :  { %v949_v50 = vpop.eup %948  ;;  %v685_v51 = vmul.f32 1.442695, %v607_v46  ;;  %v594_v52 = vmul.f32 -0.5, %v530_v47  ;;  %v417_v53 = vsub.f32 %v167_v49, %v1229_v37  ;;  %v117_v54 = vpop.permute.xlu1 %116 }
  0x86   :  { %v112_v55 = vpop.permute.xlu0 %111  ;;  %v951_v57 = vpop.eup %950  ;;  %v797_v58 = vmul.f32 %v949_v50, %v1261_v56  ;;  %v663_v59 = vmul.f32 1.442695, %v596_v48  ;;  %v407_v60 = vsub.f32 %v117_v54, %v1229_v37 }
  0x87   :  { %v406_v61 = vsub.f32 %v112_v55, %v1229_v37  ;;  %v953_v62 = vpop.eup %952  ;;  %v788_v63 = vmul.f32 %v951_v57, %v1261_v56  ;;  %954 = vpow2.f32 %v685_v51  ;;  %v659_v0 = vmul.f32 1.442695, %v594_v52 }
  0x88   :  { %v482_v1 = vmul.f32 %v1234_v39, %v417_v53  ;;  %861 = vst [vmem:[#allocation2 + $0x58] sm:$0xff] %v797_v58  ;;  %v786_v3 = vmul.f32 %v953_v62, %v1261_v56  ;;  %956 = vpow2.f32 %v663_v59  ;;  %v472_v4 = vmul.f32 %v1234_v39, %v407_v60  ;;  %v71_v59 = vld [vmem:[%s1535_s0 + $0x1d8] sm:$0xff] }
  0x89   :  { %v471_v5 = vmul.f32 %v1234_v39, %v406_v61  ;;  %852 = vst [vmem:[#allocation2 + $0x10] sm:$0xff] %v788_v63  ;;  %958 = vpow2.f32 %v659_v0  ;;  %v70_v63 = vld [vmem:[%s1535_s0 + $0x1d0] sm:$0xff]  ;;  %v69_v0 = vld [vmem:[%s1535_s0 + $0x1c8] sm:$0xff] }
  0x8a   :  { %v546_v8 = vmul.f32 %v482_v1, %v482_v1  ;;  %850 = vst [vmem:[#allocation2] sm:$0xff] %v786_v3  ;;  %v536_v9 = vmul.f32 %v472_v4, %v472_v4  ;;  %346 = vperm.xlu2 %938, %v65_v2  }
  0x8b   :  { %v535_v10 = vmul.f32 %v471_v5, %v471_v5  ;;  %341 = vperm.xlu1 %937, %v64_v6   ;;  %336 = vperm.xlu0 %936, %v63_v7  }
  0x8c   :  { %v610_v11 = vmul.f32 -0.5, %v546_v8  ;;  %v600_v12 = vmul.f32 -0.5, %v536_v9  ;;  %v182_v14 = vpop.permute.xlu2 %181 }
  0x8d   :  { %v599_v13 = vmul.f32 -0.5, %v535_v10  ;;  %v955_v15 = vpop.eup %954  ;;  %v420_v17 = vsub.f32 %v182_v14, %v1229_v37  ;;  %v132_v18 = vpop.permute.xlu1 %131 }
  0x8e   :  { %v691_v16 = vmul.f32 1.442695, %v610_v11  ;;  %v127_v19 = vpop.permute.xlu0 %126  ;;  %v957_v20 = vpop.eup %956  ;;  %v800_v21 = vmul.f32 %v955_v15, %v1261_v56  ;;  %v671_v22 = vmul.f32 1.442695, %v600_v12  ;;  %v410_v24 = vsub.f32 %v132_v18, %v1229_v37 }
  0x8f   :  { %v669_v23 = vmul.f32 1.442695, %v599_v13  ;;  %v959_v25 = vpop.eup %958  ;;  %v789_v26 = vmul.f32 %v957_v20, %v1261_v56  ;;  %v485_v27 = vmul.f32 %v1234_v39, %v420_v17  ;;  %v409_v28 = vsub.f32 %v127_v19, %v1229_v37 }
  0x90   :  { %960 = vpow2.f32 %v691_v16  ;;  %864 = vst [vmem:[#allocation2 + $0x70] sm:$0xff] %v800_v21  ;;  %v787_v30 = vmul.f32 %v959_v25, %v1261_v56  ;;  %v475_v31 = vmul.f32 %v1234_v39, %v410_v24  ;;  %v73_v25 = vld [vmem:[%s1535_s0 + $0x1e8] sm:$0xff] }
  0x91   :  { %962 = vpow2.f32 %v671_v22  ;;  %853 = vst [vmem:[#allocation2 + $0x18] sm:$0xff] %v789_v26  ;;  %v549_v34 = vmul.f32 %v485_v27, %v485_v27  ;;  %v474_v35 = vmul.f32 %v1234_v39, %v409_v28  ;;  %v74_v22 = vld [vmem:[%s1535_s0 + $0x1f0] sm:$0xff]  ;;  %v72_v26 = vld [vmem:[%s1535_s0 + $0x1e0] sm:$0xff] }
  0x92   :  { %964 = vpow2.f32 %v669_v23  ;;  %851 = vst [vmem:[#allocation2 + $0x8] sm:$0xff] %v787_v30  ;;  %v539_v36 = vmul.f32 %v475_v31, %v475_v31  ;;  %361 = vperm.xlu2 %938, %v68_v29  }
  0x93   :  { %v613_v38 = vmul.f32 -0.5, %v549_v34  ;;  %v538_v40 = vmul.f32 %v474_v35, %v474_v35  ;;  %356 = vperm.xlu1 %937, %v67_v32   ;;  %351 = vperm.xlu0 %936, %v66_v33  }
  0x94   :  { %v603_v41 = vmul.f32 -0.5, %v539_v36  ;;  %v197_v42 = vpop.permute.xlu2 %196 }
  0x95   :  { %v697_v44 = vmul.f32 1.442695, %v613_v38  ;;  %v602_v45 = vmul.f32 -0.5, %v538_v40  ;;  %v423_v46 = vsub.f32 %v197_v42, %v1229_v37  ;;  %v147_v47 = vpop.permute.xlu1 %146 }
  0x96   :  { %v961_v43 = vpop.eup %960  ;;  %v142_v48 = vpop.permute.xlu0 %141  ;;  %v677_v51 = vmul.f32 1.442695, %v603_v41  ;;  %v413_v52 = vsub.f32 %v147_v47, %v1229_v37 }
  0x97   :  { %v963_v49 = vpop.eup %962  ;;  %v803_v50 = vmul.f32 %v961_v43, %v1261_v56  ;;  %v412_v53 = vsub.f32 %v142_v48, %v1229_v37  ;;  %966 = vpow2.f32 %v697_v44  ;;  %v675_v57 = vmul.f32 1.442695, %v602_v45 }
  0x98   :  { %v965_v54 = vpop.eup %964  ;;  %v793_v55 = vmul.f32 %v963_v49, %v1261_v56  ;;  %v488_v58 = vmul.f32 %v1234_v39, %v423_v46  ;;  %968 = vpow2.f32 %v677_v51  ;;  %v478_v61 = vmul.f32 %v1234_v39, %v413_v52 }
  0x99   :  { %867 = vst [vmem:[#allocation2 + $0x88] sm:$0xff] %v803_v50  ;;  %v792_v60 = vmul.f32 %v965_v54, %v1261_v56  ;;  %v477_v62 = vmul.f32 %v1234_v39, %v412_v53  ;;  %970 = vpow2.f32 %v675_v57  ;;  %v75_v54 = vld [vmem:[%s1535_s0 + $0x1f8] sm:$0xff] }
  0x9a   :  { %857 = vst [vmem:[#allocation2 + $0x38] sm:$0xff] %v793_v55  ;;  %v552_v1 = vmul.f32 %v488_v58, %v488_v58  ;;  %v542_v2 = vmul.f32 %v478_v61, %v478_v61  ;;  %376 = vperm.xlu2 %938, %v71_v59  }
  0x9b   :  { %856 = vst [vmem:[#allocation2 + $0x30] sm:$0xff] %v792_v60  ;;  %v541_v3 = vmul.f32 %v477_v62, %v477_v62  ;;  %371 = vperm.xlu1 %937, %v70_v63   ;;  %366 = vperm.xlu0 %936, %v69_v0  }
  0x9c   :  { %v616_v4 = vmul.f32 -0.5, %v552_v1  ;;  %v606_v5 = vmul.f32 -0.5, %v542_v2  ;;  %v212_v7 = vpop.permute.xlu2 %211 }
  0x9d   :  { %v605_v6 = vmul.f32 -0.5, %v541_v3  ;;  %v967_v8 = vpop.eup %966  ;;  %v426_v10 = vsub.f32 %v212_v7, %v1229_v37  ;;  %v162_v11 = vpop.permute.xlu1 %161 }
  0x9e   :  { %v703_v9 = vmul.f32 1.442695, %v616_v4  ;;  %v157_v12 = vpop.permute.xlu0 %156  ;;  %v969_v13 = vpop.eup %968  ;;  %v806_v14 = vmul.f32 %v967_v8, %v1261_v56  ;;  %v683_v15 = vmul.f32 1.442695, %v606_v5  ;;  %v416_v17 = vsub.f32 %v162_v11, %v1229_v37 }
  0x9f   :  { %v681_v16 = vmul.f32 1.442695, %v605_v6  ;;  %v971_v18 = vpop.eup %970  ;;  %v796_v19 = vmul.f32 %v969_v13, %v1261_v56  ;;  %v491_v20 = vmul.f32 %v1234_v39, %v426_v10  ;;  %v415_v21 = vsub.f32 %v157_v12, %v1229_v37 }
  0xa0   :  { %972 = vpow2.f32 %v703_v9  ;;  %870 = vst [vmem:[#allocation2 + $0xa0] sm:$0xff] %v806_v14  ;;  %v795_v23 = vmul.f32 %v971_v18, %v1261_v56  ;;  %v481_v24 = vmul.f32 %v1234_v39, %v416_v17 }
  0xa1   :  { %974 = vpow2.f32 %v683_v15  ;;  %860 = vst [vmem:[#allocation2 + $0x50] sm:$0xff] %v796_v19  ;;  %v555_v27 = vmul.f32 %v491_v20, %v491_v20  ;;  %v480_v28 = vmul.f32 %v1234_v39, %v415_v21 }
  0xa2   :  { %976 = vpow2.f32 %v681_v16  ;;  %859 = vst [vmem:[#allocation2 + $0x48] sm:$0xff] %v795_v23  ;;  %v545_v29 = vmul.f32 %v481_v24, %v481_v24  ;;  %391 = vperm.xlu2 %938, %v74_v22  }
  0xa3   :  { %v619_v30 = vmul.f32 -0.5, %v555_v27  ;;  %v544_v31 = vmul.f32 %v480_v28, %v480_v28  ;;  %386 = vperm.xlu1 %937, %v73_v25   ;;  %381 = vperm.xlu0 %936, %v72_v26  }
  0xa4   :  { %v609_v32 = vmul.f32 -0.5, %v545_v29  ;;  %v227_v33 = vpop.permute.xlu2 %226 }
  0xa5   :  { %v709_v35 = vmul.f32 1.442695, %v619_v30  ;;  %v608_v36 = vmul.f32 -0.5, %v544_v31  ;;  %v429_v38 = vsub.f32 %v227_v33, %v1229_v37  ;;  %v177_v40 = vpop.permute.xlu1 %176 }
  0xa6   :  { %v973_v34 = vpop.eup %972  ;;  %v172_v41 = vpop.permute.xlu0 %171  ;;  %v689_v44 = vmul.f32 1.442695, %v609_v32  ;;  %v419_v45 = vsub.f32 %v177_v40, %v1229_v37 }
  0xa7   :  { %v975_v42 = vpop.eup %974  ;;  %v809_v43 = vmul.f32 %v973_v34, %v1261_v56  ;;  %v418_v46 = vsub.f32 %v172_v41, %v1229_v37  ;;  %978 = vpow2.f32 %v709_v35  ;;  %v687_v49 = vmul.f32 1.442695, %v608_v36 }
  0xa8   :  { %v977_v47 = vpop.eup %976  ;;  %v799_v48 = vmul.f32 %v975_v42, %v1261_v56  ;;  %v494_v50 = vmul.f32 %v1234_v39, %v429_v38  ;;  %980 = vpow2.f32 %v689_v44  ;;  %v484_v52 = vmul.f32 %v1234_v39, %v419_v45 }
  0xa9   :  { %873 = vst [vmem:[#allocation2 + $0xb8] sm:$0xff] %v809_v43  ;;  %v798_v51 = vmul.f32 %v977_v47, %v1261_v56  ;;  %v483_v53 = vmul.f32 %v1234_v39, %v418_v46  ;;  %982 = vpow2.f32 %v687_v49 }
  0xaa   :  { %863 = vst [vmem:[#allocation2 + $0x68] sm:$0xff] %v799_v48  ;;  %v558_v55 = vmul.f32 %v494_v50, %v494_v50  ;;  %v548_v57 = vmul.f32 %v484_v52, %v484_v52 }
  0xab   :  { %862 = vst [vmem:[#allocation2 + $0x60] sm:$0xff] %v798_v51  ;;  %v547_v58 = vmul.f32 %v483_v53, %v483_v53  ;;  %396 = vperm.xlu0 %936, %v75_v54  }
  0xac   :  { %v622_v59 = vmul.f32 -0.5, %v558_v55  ;;  %v612_v60 = vmul.f32 -0.5, %v548_v57  ;;  %v242_v62 = vpop.permute.xlu2 %241 }
  0xad   :  { %v611_v61 = vmul.f32 -0.5, %v547_v58  ;;  %v979_v63 = vpop.eup %978  ;;  %v432_v1 = vsub.f32 %v242_v62, %v1229_v37  ;;  %v192_v2 = vpop.permute.xlu1 %191 }
  0xae   :  { %v715_v0 = vmul.f32 1.442695, %v622_v59  ;;  %v187_v3 = vpop.permute.xlu0 %186  ;;  %v981_v4 = vpop.eup %980  ;;  %v812_v5 = vmul.f32 %v979_v63, %v1261_v56  ;;  %v695_v6 = vmul.f32 1.442695, %v612_v60  ;;  %v422_v8 = vsub.f32 %v192_v2, %v1229_v37 }
  0xaf   :  { %v693_v7 = vmul.f32 1.442695, %v611_v61  ;;  %v983_v9 = vpop.eup %982  ;;  %v802_v10 = vmul.f32 %v981_v4, %v1261_v56  ;;  %v497_v11 = vmul.f32 %v1234_v39, %v432_v1  ;;  %v421_v12 = vsub.f32 %v187_v3, %v1229_v37 }
  0xb0   :  { %984 = vpow2.f32 %v715_v0  ;;  %876 = vst [vmem:[#allocation2 + $0xd0] sm:$0xff] %v812_v5  ;;  %v801_v13 = vmul.f32 %v983_v9, %v1261_v56  ;;  %v487_v14 = vmul.f32 %v1234_v39, %v422_v8 }
  0xb1   :  { %986 = vpow2.f32 %v695_v6  ;;  %866 = vst [vmem:[#allocation2 + $0x80] sm:$0xff] %v802_v10  ;;  %v561_v15 = vmul.f32 %v497_v11, %v497_v11  ;;  %v486_v16 = vmul.f32 %v1234_v39, %v421_v12 }
  0xb2   :  { %988 = vpow2.f32 %v693_v7  ;;  %865 = vst [vmem:[#allocation2 + $0x78] sm:$0xff] %v801_v13  ;;  %v551_v17 = vmul.f32 %v487_v14, %v487_v14 }
  0xb3   :  { %v625_v18 = vmul.f32 -0.5, %v561_v15  ;;  %v550_v19 = vmul.f32 %v486_v16, %v486_v16 }
  0xb4   :  { %v615_v20 = vmul.f32 -0.5, %v551_v17  ;;  %v257_v21 = vpop.permute.xlu2 %256 }
  0xb5   :  { %v721_v23 = vmul.f32 1.442695, %v625_v18  ;;  %v614_v24 = vmul.f32 -0.5, %v550_v19  ;;  %v435_v25 = vsub.f32 %v257_v21, %v1229_v37  ;;  %v207_v26 = vpop.permute.xlu1 %206 }
  0xb6   :  { %v985_v22 = vpop.eup %984  ;;  %v202_v27 = vpop.permute.xlu0 %201  ;;  %v701_v30 = vmul.f32 1.442695, %v615_v20  ;;  %v425_v31 = vsub.f32 %v207_v26, %v1229_v37 }
  0xb7   :  { %v987_v28 = vpop.eup %986  ;;  %v815_v29 = vmul.f32 %v985_v22, %v1261_v56  ;;  %v424_v32 = vsub.f32 %v202_v27, %v1229_v37  ;;  %990 = vpow2.f32 %v721_v23  ;;  %v699_v35 = vmul.f32 1.442695, %v614_v24 }
  0xb8   :  { %v989_v33 = vpop.eup %988  ;;  %v805_v34 = vmul.f32 %v987_v28, %v1261_v56  ;;  %v500_v36 = vmul.f32 %v1234_v39, %v435_v25  ;;  %992 = vpow2.f32 %v701_v30  ;;  %v490_v40 = vmul.f32 %v1234_v39, %v425_v31 }
  0xb9   :  { %879 = vst [vmem:[#allocation2 + $0xe8] sm:$0xff] %v815_v29  ;;  %v804_v38 = vmul.f32 %v989_v33, %v1261_v56  ;;  %v489_v41 = vmul.f32 %v1234_v39, %v424_v32  ;;  %994 = vpow2.f32 %v699_v35 }
  0xba   :  { %869 = vst [vmem:[#allocation2 + $0x98] sm:$0xff] %v805_v34  ;;  %v564_v42 = vmul.f32 %v500_v36, %v500_v36  ;;  %v554_v43 = vmul.f32 %v490_v40, %v490_v40 }
  0xbb   :  { %868 = vst [vmem:[#allocation2 + $0x90] sm:$0xff] %v804_v38  ;;  %v553_v44 = vmul.f32 %v489_v41, %v489_v41 }
  0xbc   :  { %v628_v45 = vmul.f32 -0.5, %v564_v42  ;;  %v618_v46 = vmul.f32 -0.5, %v554_v43  ;;  %v272_v48 = vpop.permute.xlu2 %271 }
  0xbd   :  { %v617_v47 = vmul.f32 -0.5, %v553_v44  ;;  %v991_v49 = vpop.eup %990  ;;  %v438_v51 = vsub.f32 %v272_v48, %v1229_v37  ;;  %v222_v52 = vpop.permute.xlu1 %221 }
  0xbe   :  { %v727_v50 = vmul.f32 1.442695, %v628_v45  ;;  %v217_v53 = vpop.permute.xlu0 %216  ;;  %v993_v54 = vpop.eup %992  ;;  %v818_v55 = vmul.f32 %v991_v49, %v1261_v56  ;;  %v707_v57 = vmul.f32 1.442695, %v618_v46  ;;  %v428_v59 = vsub.f32 %v222_v52, %v1229_v37 }
  0xbf   :  { %v705_v58 = vmul.f32 1.442695, %v617_v47  ;;  %v995_v60 = vpop.eup %994  ;;  %v808_v61 = vmul.f32 %v993_v54, %v1261_v56  ;;  %v503_v62 = vmul.f32 %v1234_v39, %v438_v51  ;;  %v427_v63 = vsub.f32 %v217_v53, %v1229_v37 }
  0xc0   :  { %996 = vpow2.f32 %v727_v50  ;;  %882 = vst [vmem:[#allocation2 + $0x100] sm:$0xff] %v818_v55  ;;  %v807_v0 = vmul.f32 %v995_v60, %v1261_v56  ;;  %v493_v1 = vmul.f32 %v1234_v39, %v428_v59 }
  0xc1   :  { %998 = vpow2.f32 %v707_v57  ;;  %872 = vst [vmem:[#allocation2 + $0xb0] sm:$0xff] %v808_v61  ;;  %v567_v2 = vmul.f32 %v503_v62, %v503_v62  ;;  %v492_v3 = vmul.f32 %v1234_v39, %v427_v63 }
  0xc2   :  { %1000 = vpow2.f32 %v705_v58  ;;  %871 = vst [vmem:[#allocation2 + $0xa8] sm:$0xff] %v807_v0  ;;  %v557_v4 = vmul.f32 %v493_v1, %v493_v1 }
  0xc3   :  { %v631_v5 = vmul.f32 -0.5, %v567_v2  ;;  %v556_v6 = vmul.f32 %v492_v3, %v492_v3 }
  0xc4   :  { %v621_v7 = vmul.f32 -0.5, %v557_v4  ;;  %v287_v8 = vpop.permute.xlu2 %286 }
  0xc5   :  { %v733_v10 = vmul.f32 1.442695, %v631_v5  ;;  %v620_v11 = vmul.f32 -0.5, %v556_v6  ;;  %v441_v12 = vsub.f32 %v287_v8, %v1229_v37  ;;  %v237_v13 = vpop.permute.xlu1 %236 }
  0xc6   :  { %v997_v9 = vpop.eup %996  ;;  %v232_v14 = vpop.permute.xlu0 %231  ;;  %v713_v17 = vmul.f32 1.442695, %v621_v7  ;;  %v431_v18 = vsub.f32 %v237_v13, %v1229_v37 }
  0xc7   :  { %v999_v15 = vpop.eup %998  ;;  %v821_v16 = vmul.f32 %v997_v9, %v1261_v56  ;;  %v430_v19 = vsub.f32 %v232_v14, %v1229_v37  ;;  %1002 = vpow2.f32 %v733_v10  ;;  %v711_v22 = vmul.f32 1.442695, %v620_v11 }
  0xc8   :  { %v1001_v20 = vpop.eup %1000  ;;  %v811_v21 = vmul.f32 %v999_v15, %v1261_v56  ;;  %v506_v23 = vmul.f32 %v1234_v39, %v441_v12  ;;  %1004 = vpow2.f32 %v713_v17  ;;  %v496_v25 = vmul.f32 %v1234_v39, %v431_v18 }
  0xc9   :  { %885 = vst [vmem:[#allocation2 + $0x118] sm:$0xff] %v821_v16  ;;  %v810_v24 = vmul.f32 %v1001_v20, %v1261_v56  ;;  %v495_v26 = vmul.f32 %v1234_v39, %v430_v19  ;;  %1006 = vpow2.f32 %v711_v22 }
  0xca   :  { %875 = vst [vmem:[#allocation2 + $0xc8] sm:$0xff] %v811_v21  ;;  %v570_v27 = vmul.f32 %v506_v23, %v506_v23  ;;  %v560_v28 = vmul.f32 %v496_v25, %v496_v25 }
  0xcb   :  { %874 = vst [vmem:[#allocation2 + $0xc0] sm:$0xff] %v810_v24  ;;  %v559_v29 = vmul.f32 %v495_v26, %v495_v26 }
  0xcc   :  { %v634_v30 = vmul.f32 -0.5, %v570_v27  ;;  %v624_v31 = vmul.f32 -0.5, %v560_v28  ;;  %v302_v33 = vpop.permute.xlu2 %301 }
  0xcd   :  { %v623_v32 = vmul.f32 -0.5, %v559_v29  ;;  %v1003_v34 = vpop.eup %1002  ;;  %v444_v36 = vsub.f32 %v302_v33, %v1229_v37  ;;  %v252_v38 = vpop.permute.xlu1 %251 }
  0xce   :  { %v739_v35 = vmul.f32 1.442695, %v634_v30  ;;  %v247_v40 = vpop.permute.xlu0 %246  ;;  %v1005_v41 = vpop.eup %1004  ;;  %v824_v42 = vmul.f32 %v1003_v34, %v1261_v56  ;;  %v719_v43 = vmul.f32 1.442695, %v624_v31  ;;  %v434_v45 = vsub.f32 %v252_v38, %v1229_v37 }
  0xcf   :  { %v717_v44 = vmul.f32 1.442695, %v623_v32  ;;  %v1007_v46 = vpop.eup %1006  ;;  %v814_v47 = vmul.f32 %v1005_v41, %v1261_v56  ;;  %v509_v48 = vmul.f32 %v1234_v39, %v444_v36  ;;  %v433_v49 = vsub.f32 %v247_v40, %v1229_v37 }
  0xd0   :  { %1008 = vpow2.f32 %v739_v35  ;;  %888 = vst [vmem:[#allocation2 + $0x130] sm:$0xff] %v824_v42  ;;  %v813_v50 = vmul.f32 %v1007_v46, %v1261_v56  ;;  %v499_v51 = vmul.f32 %v1234_v39, %v434_v45 }
  0xd1   :  { %1010 = vpow2.f32 %v719_v43  ;;  %878 = vst [vmem:[#allocation2 + $0xe0] sm:$0xff] %v814_v47  ;;  %v573_v52 = vmul.f32 %v509_v48, %v509_v48  ;;  %v498_v53 = vmul.f32 %v1234_v39, %v433_v49 }
  0xd2   :  { %1012 = vpow2.f32 %v717_v44  ;;  %877 = vst [vmem:[#allocation2 + $0xd8] sm:$0xff] %v813_v50  ;;  %v563_v54 = vmul.f32 %v499_v51, %v499_v51 }
  0xd3   :  { %v637_v55 = vmul.f32 -0.5, %v573_v52  ;;  %v562_v57 = vmul.f32 %v498_v53, %v498_v53 }
  0xd4   :  { %v627_v58 = vmul.f32 -0.5, %v563_v54  ;;  %v317_v59 = vpop.permute.xlu2 %316 }
  0xd5   :  { %v745_v61 = vmul.f32 1.442695, %v637_v55  ;;  %v626_v62 = vmul.f32 -0.5, %v562_v57  ;;  %v447_v63 = vsub.f32 %v317_v59, %v1229_v37  ;;  %v267_v0 = vpop.permute.xlu1 %266 }
  0xd6   :  { %v1009_v60 = vpop.eup %1008  ;;  %v262_v1 = vpop.permute.xlu0 %261  ;;  %v725_v4 = vmul.f32 1.442695, %v627_v58  ;;  %v437_v5 = vsub.f32 %v267_v0, %v1229_v37 }
  0xd7   :  { %v1011_v2 = vpop.eup %1010  ;;  %v827_v3 = vmul.f32 %v1009_v60, %v1261_v56  ;;  %v436_v6 = vsub.f32 %v262_v1, %v1229_v37  ;;  %1014 = vpow2.f32 %v745_v61  ;;  %v723_v9 = vmul.f32 1.442695, %v626_v62 }
  0xd8   :  { %v1013_v7 = vpop.eup %1012  ;;  %v817_v8 = vmul.f32 %v1011_v2, %v1261_v56  ;;  %v512_v10 = vmul.f32 %v1234_v39, %v447_v63  ;;  %1016 = vpow2.f32 %v725_v4  ;;  %v502_v12 = vmul.f32 %v1234_v39, %v437_v5 }
  0xd9   :  { %891 = vst [vmem:[#allocation2 + $0x148] sm:$0xff] %v827_v3  ;;  %v816_v11 = vmul.f32 %v1013_v7, %v1261_v56  ;;  %v501_v13 = vmul.f32 %v1234_v39, %v436_v6  ;;  %1018 = vpow2.f32 %v723_v9  ;;  %v1466_v9 = vld [vmem:[%s1536_s1] ss:$0 sm:$0xff] }
  0xda   :  { %881 = vst [vmem:[#allocation2 + $0xf8] sm:$0xff] %v817_v8  ;;  %v576_v14 = vmul.f32 %v512_v10, %v512_v10  ;;  %v566_v15 = vmul.f32 %v502_v12, %v502_v12 }
  0xdb   :  { %880 = vst [vmem:[#allocation2 + $0xf0] sm:$0xff] %v816_v11  ;;  %v565_v16 = vmul.f32 %v501_v13, %v501_v13 }
  0xdc   :  { %v640_v17 = vmul.f32 -0.5, %v576_v14  ;;  %v630_v18 = vmul.f32 -0.5, %v566_v15  ;;  %v332_v20 = vpop.permute.xlu2 %331 }
  0xdd   :  { %v629_v19 = vmul.f32 -0.5, %v565_v16  ;;  %v1015_v21 = vpop.eup %1014  ;;  %v450_v23 = vsub.f32 %v332_v20, %v1229_v37  ;;  %v282_v24 = vpop.permute.xlu1 %281 }
  0xde   :  { %v751_v22 = vmul.f32 1.442695, %v640_v17  ;;  %v277_v25 = vpop.permute.xlu0 %276  ;;  %v1017_v26 = vpop.eup %1016  ;;  %v830_v27 = vmul.f32 %v1015_v21, %v1261_v56  ;;  %v731_v28 = vmul.f32 1.442695, %v630_v18  ;;  %v440_v30 = vsub.f32 %v282_v24, %v1229_v37 }
  0xdf   :  { %v729_v29 = vmul.f32 1.442695, %v629_v19  ;;  %v1019_v31 = vpop.eup %1018  ;;  %v820_v32 = vmul.f32 %v1017_v26, %v1261_v56  ;;  %v515_v33 = vmul.f32 %v1234_v39, %v450_v23  ;;  %v439_v34 = vsub.f32 %v277_v25, %v1229_v37  ;;  %v1475_v19 = vld [vmem:[%s1536_s1 + $0x1] ss:$0 sm:$0xff] }
  0xe0   :  { %1020 = vpow2.f32 %v751_v22  ;;  %894 = vst [vmem:[#allocation2 + $0x160] sm:$0xff] %v830_v27  ;;  %v819_v35 = vmul.f32 %v1019_v31, %v1261_v56  ;;  %v505_v36 = vmul.f32 %v1234_v39, %v440_v30 }
  0xe1   :  { %1022 = vpow2.f32 %v731_v28  ;;  %884 = vst [vmem:[#allocation2 + $0x110] sm:$0xff] %v820_v32  ;;  %v579_v38 = vmul.f32 %v515_v33, %v515_v33  ;;  %v504_v40 = vmul.f32 %v1234_v39, %v439_v34 }
  0xe2   :  { %1024 = vpow2.f32 %v729_v29  ;;  %883 = vst [vmem:[#allocation2 + $0x108] sm:$0xff] %v819_v35  ;;  %v569_v41 = vmul.f32 %v505_v36, %v505_v36 }
  0xe3   :  { %v643_v42 = vmul.f32 -0.5, %v579_v38  ;;  %v568_v43 = vmul.f32 %v504_v40, %v504_v40  ;;  %v1486_v38 = vld [vmem:[%s1536_s1 + $0x2] ss:$0 sm:$0xff]  ;;  %s1100_s1 = smov [#allocation2]  }
  0xe4   :  { %v633_v44 = vmul.f32 -0.5, %v569_v41  ;;  %v347_v45 = vpop.permute.xlu2 %346  ;;  %s918_s8 = sshll.u32 %s1100_s1, 4  ;;  %s919_s8 = int_to_ptr.vmem [resolvable:$true] %s918_s8 }
  0xe5   :  { %v757_v47 = vmul.f32 1.442695, %v643_v42  ;;  %v632_v48 = vmul.f32 -0.5, %v568_v43  ;;  %v453_v49 = vsub.f32 %v347_v45, %v1229_v37  ;;  %v297_v50 = vpop.permute.xlu1 %296 }
  0xe6   :  { %v1021_v46 = vpop.eup %1020  ;;  %v292_v51 = vpop.permute.xlu0 %291  ;;  %v737_v54 = vmul.f32 1.442695, %v633_v44  ;;  %v443_v55 = vsub.f32 %v297_v50, %v1229_v37 }
  0xe7   :  { %v1023_v52 = vpop.eup %1022  ;;  %v833_v53 = vmul.f32 %v1021_v46, %v1261_v56  ;;  %v442_v57 = vsub.f32 %v292_v51, %v1229_v37  ;;  %1026 = vpow2.f32 %v757_v47  ;;  %v735_v60 = vmul.f32 1.442695, %v632_v48 }
  0xe8   :  { %v1025_v58 = vpop.eup %1024  ;;  %v823_v59 = vmul.f32 %v1023_v52, %v1261_v56  ;;  %v518_v61 = vmul.f32 %v1234_v39, %v453_v49  ;;  %1028 = vpow2.f32 %v737_v54  ;;  %v508_v63 = vmul.f32 %v1234_v39, %v443_v55 }
  0xe9   :  { %897 = vst [vmem:[#allocation2 + $0x178] sm:$0xff] %v833_v53  ;;  %v822_v62 = vmul.f32 %v1025_v58, %v1261_v56  ;;  %v507_v0 = vmul.f32 %v1234_v39, %v442_v57  ;;  %1030 = vpow2.f32 %v735_v60 }
  0xea   :  { %887 = vst [vmem:[#allocation2 + $0x128] sm:$0xff] %v823_v59  ;;  %v582_v1 = vmul.f32 %v518_v61, %v518_v61  ;;  %v572_v37 = vmul.f32 %v508_v63, %v508_v63 }
  0xeb   :  { %886 = vst [vmem:[#allocation2 + $0x120] sm:$0xff] %v822_v62  ;;  %v571_v2 = vmul.f32 %v507_v0, %v507_v0 }
  0xec   :  { %v646_v3 = vmul.f32 -0.5, %v582_v1  ;;  %v636_v4 = vmul.f32 -0.5, %v572_v37  ;;  %v362_v6 = vpop.permute.xlu2 %361 }
  0xed   :  { %v635_v5 = vmul.f32 -0.5, %v571_v2  ;;  %v1027_v7 = vpop.eup %1026  ;;  %v456_v10 = vsub.f32 %v362_v6, %v1466_v9  ;;  %v312_v39 = vpop.permute.xlu1 %311 }
  0xee   :  { %v763_v8 = vmul.f32 1.442695, %v646_v3  ;;  %v307_v11 = vpop.permute.xlu0 %306  ;;  %v1029_v12 = vpop.eup %1028  ;;  %v836_v13 = vmul.f32 %v1027_v7, %v1261_v56  ;;  %v743_v14 = vmul.f32 1.442695, %v636_v4  ;;  %v446_v16 = vsub.f32 %v312_v39, %v1466_v9 }
  0xef   :  { %v741_v15 = vmul.f32 1.442695, %v635_v5  ;;  %v1031_v17 = vpop.eup %1030  ;;  %v826_v18 = vmul.f32 %v1029_v12, %v1261_v56  ;;  %v521_v20 = vmul.f32 %v1475_v19, %v456_v10  ;;  %v445_v21 = vsub.f32 %v307_v11, %v1466_v9 }
  0xf0   :  { %1032 = vpow2.f32 %v763_v8  ;;  %900 = vst [vmem:[#allocation2 + $0x190] sm:$0xff] %v836_v13  ;;  %v825_v22 = vmul.f32 %v1031_v17, %v1261_v56  ;;  %v511_v23 = vmul.f32 %v1475_v19, %v446_v16 }
  0xf1   :  { %1034 = vpow2.f32 %v743_v14  ;;  %890 = vst [vmem:[#allocation2 + $0x140] sm:$0xff] %v826_v18  ;;  %v585_v24 = vmul.f32 %v521_v20, %v521_v20  ;;  %v510_v25 = vmul.f32 %v1475_v19, %v445_v21 }
  0xf2   :  { %1036 = vpow2.f32 %v741_v15  ;;  %889 = vst [vmem:[#allocation2 + $0x138] sm:$0xff] %v825_v22  ;;  %v575_v26 = vmul.f32 %v511_v23, %v511_v23 }
  0xf3   :  { %v649_v27 = vmul.f32 -0.5, %v585_v24  ;;  %v574_v28 = vmul.f32 %v510_v25, %v510_v25 }
  0xf4   :  { %v639_v29 = vmul.f32 -0.5, %v575_v26  ;;  %v377_v30 = vpop.permute.xlu2 %376 }
  0xf5   :  { %v769_v32 = vmul.f32 1.442695, %v649_v27  ;;  %v638_v33 = vmul.f32 -0.5, %v574_v28  ;;  %v459_v34 = vsub.f32 %v377_v30, %v1466_v9  ;;  %v327_v56 = vpop.permute.xlu1 %326 }
  0xf6   :  { %v1033_v31 = vpop.eup %1032  ;;  %v322_v35 = vpop.permute.xlu0 %321  ;;  %v749_v41 = vmul.f32 1.442695, %v639_v29  ;;  %v449_v42 = vsub.f32 %v327_v56, %v1466_v9 }
  0xf7   :  { %v1035_v36 = vpop.eup %1034  ;;  %v839_v40 = vmul.f32 %v1486_v38, %v1033_v31  ;;  %v448_v43 = vsub.f32 %v322_v35, %v1466_v9  ;;  %1038 = vpow2.f32 %v769_v32  ;;  %v747_v46 = vmul.f32 1.442695, %v638_v33 }
  0xf8   :  { %v1037_v44 = vpop.eup %1036  ;;  %v829_v45 = vmul.f32 %v1486_v38, %v1035_v36  ;;  %v524_v47 = vmul.f32 %v1475_v19, %v459_v34  ;;  %1040 = vpow2.f32 %v749_v41  ;;  %v514_v49 = vmul.f32 %v1475_v19, %v449_v42 }
  0xf9   :  { %903 = vst [vmem:[#allocation2 + $0x1a8] sm:$0xff] %v839_v40  ;;  %v828_v48 = vmul.f32 %v1486_v38, %v1037_v44  ;;  %v513_v50 = vmul.f32 %v1475_v19, %v448_v43  ;;  %1042 = vpow2.f32 %v747_v46 }
  0xfa   :  { %893 = vst [vmem:[#allocation2 + $0x158] sm:$0xff] %v829_v45  ;;  %v588_v51 = vmul.f32 %v524_v47, %v524_v47  ;;  %v578_v52 = vmul.f32 %v514_v49, %v514_v49 }
  0xfb   :  { %892 = vst [vmem:[#allocation2 + $0x150] sm:$0xff] %v828_v48  ;;  %v577_v53 = vmul.f32 %v513_v50, %v513_v50 }
  0xfc   :  { %v652_v54 = vmul.f32 -0.5, %v588_v51  ;;  %v642_v55 = vmul.f32 -0.5, %v578_v52  ;;  %v392_v58 = vpop.permute.xlu2 %391 }
  0xfd   :  { %v641_v57 = vmul.f32 -0.5, %v577_v53  ;;  %v1039_v59 = vpop.eup %1038  ;;  %v462_v61 = vsub.f32 %v392_v58, %v1466_v9  ;;  %v342_v62 = vpop.permute.xlu1 %341 }
  0xfe   :  { %v775_v60 = vmul.f32 1.442695, %v652_v54  ;;  %v337_v63 = vpop.permute.xlu0 %336  ;;  %v1041_v0 = vpop.eup %1040  ;;  %v842_v1 = vmul.f32 %v1486_v38, %v1039_v59  ;;  %v755_v37 = vmul.f32 1.442695, %v642_v55  ;;  %v452_v3 = vsub.f32 %v342_v62, %v1466_v9 }
  0xff   :  { %v753_v2 = vmul.f32 1.442695, %v641_v57  ;;  %v1043_v4 = vpop.eup %1042  ;;  %v832_v5 = vmul.f32 %v1486_v38, %v1041_v0  ;;  %v527_v6 = vmul.f32 %v1475_v19, %v462_v61  ;;  %v451_v7 = vsub.f32 %v337_v63, %v1466_v9 }
 0x100   :  { %1044 = vpow2.f32 %v775_v60  ;;  %906 = vst [vmem:[#allocation2 + $0x1c0] sm:$0xff] %v842_v1  ;;  %v831_v8 = vmul.f32 %v1486_v38, %v1043_v4  ;;  %v517_v10 = vmul.f32 %v1475_v19, %v452_v3 }
 0x101   :  { %1046 = vpow2.f32 %v755_v37  ;;  %896 = vst [vmem:[#allocation2 + $0x170] sm:$0xff] %v832_v5  ;;  %v591_v39 = vmul.f32 %v527_v6, %v527_v6  ;;  %v516_v11 = vmul.f32 %v1475_v19, %v451_v7 }
 0x102   :  { %1048 = vpow2.f32 %v753_v2  ;;  %895 = vst [vmem:[#allocation2 + $0x168] sm:$0xff] %v831_v8  ;;  %v581_v12 = vmul.f32 %v517_v10, %v517_v10 }
 0x103   :  { %v655_v13 = vmul.f32 -0.5, %v591_v39  ;;  %v580_v14 = vmul.f32 %v516_v11, %v516_v11 }
 0x104   :  { %v645_v15 = vmul.f32 -0.5, %v581_v12 }
 0x105   :  { %v781_v17 = vmul.f32 1.442695, %v655_v13  ;;  %v644_v18 = vmul.f32 -0.5, %v580_v14  ;;  %v357_v20 = vpop.permute.xlu1 %356 }
 0x106   :  { %v1045_v16 = vpop.eup %1044  ;;  %v352_v21 = vpop.permute.xlu0 %351  ;;  %v761_v24 = vmul.f32 1.442695, %v645_v15  ;;  %v455_v25 = vsub.f32 %v357_v20, %v1466_v9 }
 0x107   :  { %v1047_v22 = vpop.eup %1046  ;;  %v845_v23 = vmul.f32 %v1486_v38, %v1045_v16  ;;  %v454_v26 = vsub.f32 %v352_v21, %v1466_v9  ;;  %1050 = vpow2.f32 %v781_v17  ;;  %v759_v29 = vmul.f32 1.442695, %v644_v18 }
 0x108   :  { %v1049_v27 = vpop.eup %1048  ;;  %v835_v28 = vmul.f32 %v1486_v38, %v1047_v22  ;;  %1052 = vpow2.f32 %v761_v24  ;;  %v520_v31 = vmul.f32 %v1475_v19, %v455_v25 }
 0x109   :  { %909 = vst [vmem:[#allocation2 + $0x1d8] sm:$0xff] %v845_v23  ;;  %v834_v30 = vmul.f32 %v1486_v38, %v1049_v27  ;;  %v519_v32 = vmul.f32 %v1475_v19, %v454_v26  ;;  %1054 = vpow2.f32 %v759_v29 }
 0x10a   :  { %899 = vst [vmem:[#allocation2 + $0x188] sm:$0xff] %v835_v28  ;;  %v584_v33 = vmul.f32 %v520_v31, %v520_v31 }
 0x10b   :  { %898 = vst [vmem:[#allocation2 + $0x180] sm:$0xff] %v834_v30  ;;  %v583_v34 = vmul.f32 %v519_v32, %v519_v32 }
 0x10c   :  { %v648_v56 = vmul.f32 -0.5, %v584_v33 }
 0x10d   :  { %v647_v35 = vmul.f32 -0.5, %v583_v34  ;;  %v1051_v36 = vpop.eup %1050  ;;  %v372_v40 = vpop.permute.xlu1 %371 }
 0x10e   :  { %v367_v41 = vpop.permute.xlu0 %366  ;;  %v1053_v42 = vpop.eup %1052  ;;  %v848_v43 = vmul.f32 %v1486_v38, %v1051_v36  ;;  %v767_v44 = vmul.f32 1.442695, %v648_v56  ;;  %v458_v46 = vsub.f32 %v372_v40, %v1466_v9 }
 0x10f   :  { %v765_v45 = vmul.f32 1.442695, %v647_v35  ;;  %v1055_v47 = vpop.eup %1054  ;;  %v838_v48 = vmul.f32 %v1486_v38, %v1053_v42  ;;  %v457_v49 = vsub.f32 %v367_v41, %v1466_v9 }
 0x110   :  { %912 = vst [vmem:[#allocation2 + $0x1f0] sm:$0xff] %v848_v43  ;;  %v837_v50 = vmul.f32 %v1486_v38, %v1055_v47  ;;  %1056 = vpow2.f32 %v767_v44  ;;  %v523_v51 = vmul.f32 %v1475_v19, %v458_v46 }
 0x111   :  { %902 = vst [vmem:[#allocation2 + $0x1a0] sm:$0xff] %v838_v48  ;;  %1058 = vpow2.f32 %v765_v45  ;;  %v522_v52 = vmul.f32 %v1475_v19, %v457_v49 }
 0x112   :  { %901 = vst [vmem:[#allocation2 + $0x198] sm:$0xff] %v837_v50  ;;  %v587_v53 = vmul.f32 %v523_v51, %v523_v51 }
 0x113   :  { %v586_v54 = vmul.f32 %v522_v52, %v522_v52 }
 0x114   :  { %v651_v55 = vmul.f32 -0.5, %v587_v53 }
 0x115   :  { %v650_v57 = vmul.f32 -0.5, %v586_v54  ;;  %v387_v58 = vpop.permute.xlu1 %386 }
 0x116   :  { %v382_v59 = vpop.permute.xlu0 %381  ;;  %v1057_v60 = vpop.eup %1056  ;;  %v773_v61 = vmul.f32 1.442695, %v651_v55  ;;  %v461_v62 = vsub.f32 %v387_v58, %v1466_v9 }
 0x117   :  { %v460_v63 = vsub.f32 %v382_v59, %v1466_v9  ;;  %v1059_v0 = vpop.eup %1058  ;;  %v841_v1 = vmul.f32 %v1486_v38, %v1057_v60  ;;  %v771_v37 = vmul.f32 1.442695, %v650_v57 }
 0x118   :  { %v840_v2 = vmul.f32 %v1486_v38, %v1059_v0  ;;  %1060 = vpow2.f32 %v773_v61  ;;  %v526_v3 = vmul.f32 %v1475_v19, %v461_v62 }
 0x119   :  { %v525_v4 = vmul.f32 %v1475_v19, %v460_v63  ;;  %905 = vst [vmem:[#allocation2 + $0x1b8] sm:$0xff] %v841_v1  ;;  %1062 = vpow2.f32 %v771_v37 }
 0x11a   :  { %904 = vst [vmem:[#allocation2 + $0x1b0] sm:$0xff] %v840_v2  ;;  %v590_v5 = vmul.f32 %v526_v3, %v526_v3 }
 0x11b   :  { %v589_v6 = vmul.f32 %v525_v4, %v525_v4 }
 0x11c   :  { %v654_v7 = vmul.f32 -0.5, %v590_v5 }
 0x11d   :  { %v653_v8 = vmul.f32 -0.5, %v589_v6 }
 0x11e   :  { %v397_v10 = vpop.permute.xlu0 %396  ;;  %v1061_v39 = vpop.eup %1060  ;;  %v779_v11 = vmul.f32 1.442695, %v654_v7 }
 0x11f   :  { %v777_v12 = vmul.f32 1.442695, %v653_v8  ;;  %v463_v13 = vsub.f32 %v397_v10, %v1466_v9  ;;  %v1063_v14 = vpop.eup %1062  ;;  %v844_v15 = vmul.f32 %v1486_v38, %v1061_v39 }
 0x120   :  { %v843_v16 = vmul.f32 %v1486_v38, %v1063_v14  ;;  %1064 = vpow2.f32 %v779_v11 }
 0x121   :  { %v528_v17 = vmul.f32 %v1475_v19, %v463_v13  ;;  %908 = vst [vmem:[#allocation2 + $0x1d0] sm:$0xff] %v844_v15  ;;  %1066 = vpow2.f32 %v777_v12 }
 0x122   :  { %907 = vst [vmem:[#allocation2 + $0x1c8] sm:$0xff] %v843_v16 }
 0x123   :  { %v592_v18 = vmul.f32 %v528_v17, %v528_v17 }
 0x125   :  { %v656_v20 = vmul.f32 -0.5, %v592_v18 }
 0x126   :  { %v1065_v21 = vpop.eup %1064 }
 0x127   :  { %v783_v22 = vmul.f32 1.442695, %v656_v20  ;;  %v1067_v23 = vpop.eup %1066  ;;  %v847_v24 = vmul.f32 %v1486_v38, %v1065_v21 }
 0x128   :  { %v846_v9 = vmul.f32 %v1486_v38, %v1067_v23 }
 0x129   :  { %1068 = vpow2.f32 %v783_v22  ;;  %911 = vst [vmem:[#allocation2 + $0x1e8] sm:$0xff] %v847_v24 }
 0x12a   :  { %910 = vst [vmem:[#allocation2 + $0x1e0] sm:$0xff] %v846_v9 }
 0x12f   :  { %v1069_v19 = vpop.eup %1068 }
 0x130   :  { %v849_v25 = vmul.f32 %v1486_v38, %v1069_v19 }
 0x132   :  { %913 = vst [vmem:[#allocation2 + $0x1f8] sm:$0xff] %v849_v25 }
 0x133   :  { %926 = dma.vmem_to_hbm [thread:$0]  %s919_s8, 8192, %s921_s11, [#allocation3], %s1101_s12, %s1101_s12, %s1102_s13  }
 0x134   :  { %1097 = dma.done.wait [#allocation3], 8192  }
 0x135   :  { %1098 = vsyncadd [#allocation3], 4294959104 }
 0x136   :  { %931 = vsyncpa [#allocation3], 1 }

</bundles_post_ra>
